<compile_context>
chip_gen: v5e
topology: v5e:2x2
jax: 0.10.0
libtpu: 0.0.40
codegen_flags: <defaults>
</compile_context>

<pallas_src>
import functools

import jax
import jax.numpy as jnp
from jax.experimental import pallas as pl
from jax.experimental.pallas import tpu as pltpu


def _cdiv(a, b):
    return (a + b - 1) // b


def _round_up(n, m):
    return _cdiv(n, m) * m


def pgn_kernel(x_ref, w1_ref, w23_ref, b_ref, o_ref, *, hidden, actions):
    """One batch tile of the 3-layer MLP.

    x_ref  : (TM, d_in)         bf16
    w1_ref : (d_in, hidden)     bf16
    w23_ref: (2*hidden, hidden) bf16 slab = [w2 ; w3 zero-padded to `hidden` lanes]
    b_ref  : (3, hidden)        f32  slab = [b1 ; b2 ; b3 zero-padded]
    o_ref  : (TM, actions)      f32
    """
    x = x_ref[...]
    w1 = w1_ref[...]
    w2 = w23_ref[0:hidden, :]
    w3 = w23_ref[hidden:2 * hidden, :]
    b1 = b_ref[0:1, :]
    b2 = b_ref[1:2, :]
    b3 = b_ref[2:3, :]

    # fcl1 + ReLU  (bf16 operands, f32 accumulate on the MXU)
    h1 = jnp.dot(x, w1, preferred_element_type=jnp.float32) + b1
    h1 = jnp.maximum(h1, 0.0).astype(jnp.bfloat16)
    # fcl2 + ReLU
    h2 = jnp.dot(h1, w2, preferred_element_type=jnp.float32) + b2
    h2 = jnp.maximum(h2, 0.0).astype(jnp.bfloat16)
    # fcl3 (logits, no activation); only the first `actions` lanes go to HBM.
    out = jnp.dot(h2, w3, preferred_element_type=jnp.float32) + b3
    o_ref[...] = out[:, :actions].astype(o_ref.dtype)


def pack_pgn_params(params):
    """One-time packing (do NOT call per forward step): bf16 weights,
    w2/w3 fused into one lane-dense slab, biases fused into one f32 slab."""
    bf = jnp.bfloat16
    w1 = params["w1"].astype(bf)                       # (d_in, hidden)
    hidden = w1.shape[1]
    A = params["w3"].shape[1]

    w3_p = jnp.zeros((hidden, hidden), bf).at[:, :A].set(params["w3"].astype(bf))
    w23 = jnp.concatenate([params["w2"].astype(bf), w3_p], axis=0)  # (2*hidden, hidden)

    b = jnp.zeros((3, hidden), jnp.float32)
    b = b.at[0, :].set(params["b1"].reshape(-1))
    b = b.at[1, :].set(params["b2"].reshape(-1))
    b = b.at[2, :A].set(params["b3"].reshape(-1))
    return {"w1": w1, "w23": w23, "b": b}


def pgn_forward(x, packed, actions_num):
    """x: (B, d_in) f32.  packed: dict from pack_pgn_params (bf16/f32 slabs)."""
    w1, w23, b_slab = packed["w1"], packed["w23"], packed["b"]
    d_in, hidden = w1.shape
    B = x.shape[0]
    A = actions_num

    # Batch tiling: big tiles (fewer ~0.35us grid steps), but >= 2 steps
    # whenever B > 8 so both v7x TensorCores get work; the step count is
    # chosen to minimize row padding instead of rounding B to a fixed TM.
    max_tm = 2048
    B8 = _round_up(B, 8)
    n_steps = 1 if B8 <= 8 else max(2, _cdiv(B8, max_tm))
    TM = _round_up(_cdiv(B8, n_steps), 8)
    B_pad = TM * n_steps

    x_bf = x.astype(jnp.bfloat16)
    if B_pad != B:
        x_bf = jnp.zeros((B_pad, d_in), jnp.bfloat16).at[:B, :].set(x_bf)

    kernel = functools.partial(pgn_kernel, hidden=hidden, actions=A)

    out = pl.pallas_call(
        kernel,
        out_shape=jax.ShapeDtypeStruct((B_pad, A), jnp.float32),
        grid=(n_steps,),
        in_specs=[
            pl.BlockSpec((TM, d_in), lambda i: (i, 0)),             # x: tiled over batch
            pl.BlockSpec((d_in, hidden), lambda i: (0, 0)),         # w1: VMEM-resident
            pl.BlockSpec((2 * hidden, hidden), lambda i: (0, 0)),   # [w2; w3] slab
            pl.BlockSpec((3, hidden), lambda i: (0, 0)),            # [b1; b2; b3] slab
        ],
        out_specs=pl.BlockSpec((TM, A), lambda i: (i, 0)),
        compiler_params=pltpu.CompilerParams(
            dimension_semantics=("parallel",)),                     # shard grid on v7x TCs
    )(x_bf, w1, w23, b_slab)

    return out if B_pad == B else out[:B]


def init_pgn_params(key, input_size, actions_num, hidden=128):
    """Deterministic init mimicking PyTorch nn.Linear default (U[-1/sqrt(fan_in), +])."""
    ks = jax.random.split(key, 6)

    def linear(kw, kb, fan_in, fan_out):
        bound = 1.0 / jnp.sqrt(float(fan_in))
        # stored as (fan_in, fan_out) so forward is x @ W
        w = jax.random.uniform(kw, (fan_in, fan_out), jnp.float32, -bound, bound)
        b = jax.random.uniform(kb, (1, fan_out), jnp.float32, -bound, bound)
        return w, b

    w1, b1 = linear(ks[0], ks[1], input_size, hidden)
    w2, b2 = linear(ks[2], ks[3], hidden, hidden)
    w3, b3 = linear(ks[4], ks[5], hidden, actions_num)
    return dict(w1=w1, b1=b1, w2=w2, b2=b2, w3=w3, b3=b3)


def pgn_reference_bf16(x, p):
    """Reference matching the kernel's numerics (bf16 operands, f32 accumulate)."""
    bf = jnp.bfloat16
    h1 = jnp.maximum(
        jnp.dot(x.astype(bf), p["w1"].astype(bf),
                preferred_element_type=jnp.float32) + p["b1"], 0.0)
    h2 = jnp.maximum(
        jnp.dot(h1.astype(bf), p["w2"].astype(bf),
                preferred_element_type=jnp.float32) + p["b2"], 0.0)
    return jnp.dot(h2.astype(bf), p["w3"].astype(bf),
                   preferred_element_type=jnp.float32) + p["b3"]


def pgn_reference_f32(x, p):
    h1 = jnp.maximum(x @ p["w1"] + p["b1"], 0.0)
    h2 = jnp.maximum(h1 @ p["w2"] + p["b2"], 0.0)
    return h2 @ p["w3"] + p["b3"]


if __name__ == "__main__":
    key = jax.random.PRNGKey(0)
    k_param, k_x1, k_x2 = jax.random.split(key, 3)

    input_size = 8       # e.g. LunarLander-like observation dim
    actions_num = 4

    params = init_pgn_params(k_param, input_size, actions_num, hidden=128)
    packed = pack_pgn_params(params)      # hoisted out of the per-call path

    fwd = jax.jit(pgn_forward, static_argnames=("actions_num",))

    # batch=8 exercises the single-step grid; batch=200 exercises grid=2 with
    # row padding (multi-TensorCore path on v7x).
    for k_x, batch in ((k_x1, 8), (k_x2, 200)):
        x = jax.random.normal(k_x, (batch, input_size), jnp.float32)
        out = jax.block_until_ready(fwd(x, packed, actions_num=actions_num))
        assert out.shape == (batch, actions_num)

        ref_bf16 = pgn_reference_bf16(x, params)
        ref_f32 = pgn_reference_f32(x, params)
        assert jnp.allclose(out, ref_bf16, atol=2e-3, rtol=2e-3), "mismatch vs bf16 reference"
        assert jnp.allclose(out, ref_f32, atol=5e-2, rtol=5e-2), "mismatch vs f32 reference"

    # TODO(synk): Adam optimizer / save_model / load_model are training & I/O
    # utilities with no forward-pass Pallas equivalent; not implemented here.
    print("KERNEL_OK")
</pallas_src>

<mosaic_0001>
module attributes {stable_mosaic.version = 11 : i64} {
  func.func @pgn_kernel(%arg0: i32, %arg1: memref<8x8xbf16, #tpu.memory_space<vmem>>, %arg2: memref<8x128xbf16, #tpu.memory_space<vmem>>, %arg3: memref<256x128xbf16, #tpu.memory_space<vmem>>, %arg4: memref<3x128xf32, #tpu.memory_space<vmem>>, %arg5: memref<8x4xf32, #tpu.memory_space<vmem>>) attributes {dimension_semantics = [#tpu.dimension_semantics<parallel>], iteration_bounds = array<i64: 1>, scalar_prefetch = 0 : i64, scratch_operands = 0 : i64, tpu.core_type = #tpu.core_type<tc>, window_params = [{transform_indices = @transform_0, window_bounds = array<i64: 8, 8>}, {pipeline_mode = #tpu.pipeline_mode<synchronous>, transform_indices = @transform_1, window_bounds = array<i64: 8, 128>}, {pipeline_mode = #tpu.pipeline_mode<synchronous>, transform_indices = @transform_2, window_bounds = array<i64: 256, 128>}, {pipeline_mode = #tpu.pipeline_mode<synchronous>, transform_indices = @transform_3, window_bounds = array<i64: 3, 128>}, {transform_indices = @transform_4, window_bounds = array<i64: 8, 4>}]} {
    %c0 = arith.constant 0 : index
    %c0_0 = arith.constant 0 : index
    %0 = vector.load %arg1[%c0, %c0_0] : memref<8x8xbf16, #tpu.memory_space<vmem>>, vector<8x8xbf16>
    %c0_1 = arith.constant 0 : index
    %c0_2 = arith.constant 0 : index
    %1 = vector.load %arg2[%c0_1, %c0_2] : memref<8x128xbf16, #tpu.memory_space<vmem>>, vector<8x128xbf16>
    %c0_3 = arith.constant 0 : index
    %c0_4 = arith.constant 0 : index
    %2 = vector.load %arg3[%c0_3, %c0_4] : memref<256x128xbf16, #tpu.memory_space<vmem>>, vector<128x128xbf16>
    %c128 = arith.constant 128 : index
    %c0_5 = arith.constant 0 : index
    %3 = vector.load %arg3[%c128, %c0_5] : memref<256x128xbf16, #tpu.memory_space<vmem>>, vector<128x128xbf16>
    %c0_6 = arith.constant 0 : index
    %c0_7 = arith.constant 0 : index
    %4 = vector.load %arg4[%c0_6, %c0_7] : memref<3x128xf32, #tpu.memory_space<vmem>>, vector<1x128xf32>
    %c1 = arith.constant 1 : index
    %c0_8 = arith.constant 0 : index
    %5 = vector.load %arg4[%c1, %c0_8] : memref<3x128xf32, #tpu.memory_space<vmem>>, vector<1x128xf32>
    %c2 = arith.constant 2 : index
    %c0_9 = arith.constant 0 : index
    %6 = vector.load %arg4[%c2, %c0_9] : memref<3x128xf32, #tpu.memory_space<vmem>>, vector<1x128xf32>
    %cst = arith.constant dense<0.000000e+00> : vector<8x128xf32>
    %7 = tpu.matmul %0, %1, %cst {dimension_numbers = #tpu.dot_dimension_numbers<[1], [0], [0], [1], [0, 0, 1, 1], [], []>} : vector<8x8xbf16>, vector<8x128xbf16>, vector<8x128xf32> -> vector<8x128xf32>
    %8 = vector.broadcast %4 : vector<1x128xf32> to vector<8x128xf32>
    %9 = arith.addf %7, %8 : vector<8x128xf32>
    %cst_10 = arith.constant 0.000000e+00 : f32
    %10 = vector.broadcast %cst_10 : f32 to vector<8x128xf32>
    %11 = arith.maximumf %9, %10 : vector<8x128xf32>
    %12 = arith.truncf %11 : vector<8x128xf32> to vector<8x128xbf16>
    %cst_11 = arith.constant dense<0.000000e+00> : vector<8x128xf32>
    %13 = tpu.matmul %12, %2, %cst_11 {dimension_numbers = #tpu.dot_dimension_numbers<[1], [0], [0], [1], [0, 0, 1, 1], [], []>} : vector<8x128xbf16>, vector<128x128xbf16>, vector<8x128xf32> -> vector<8x128xf32>
    %14 = vector.broadcast %5 : vector<1x128xf32> to vector<8x128xf32>
    %15 = arith.addf %13, %14 : vector<8x128xf32>
    %cst_12 = arith.constant 0.000000e+00 : f32
    %16 = vector.broadcast %cst_12 : f32 to vector<8x128xf32>
    %17 = arith.maximumf %15, %16 : vector<8x128xf32>
    %18 = arith.truncf %17 : vector<8x128xf32> to vector<8x128xbf16>
    %cst_13 = arith.constant dense<0.000000e+00> : vector<8x128xf32>
    %19 = tpu.matmul %18, %3, %cst_13 {dimension_numbers = #tpu.dot_dimension_numbers<[1], [0], [0], [1], [0, 0, 1, 1], [], []>} : vector<8x128xbf16>, vector<128x128xbf16>, vector<8x128xf32> -> vector<8x128xf32>
    %20 = vector.broadcast %6 : vector<1x128xf32> to vector<8x128xf32>
    %21 = arith.addf %19, %20 : vector<8x128xf32>
    %22 = vector.extract_strided_slice %21 {offsets = [0, 0], sizes = [8, 4], strides = [1, 1]} : vector<8x128xf32> to vector<8x4xf32>
    %c0_14 = arith.constant 0 : index
    %c0_15 = arith.constant 0 : index
    %23 = vector.load %arg5[%c0_14, %c0_15] : memref<8x4xf32, #tpu.memory_space<vmem>>, vector<8x4xf32>
    tpu.vector_store %arg5[%c0_14, %c0_15], %22 {strides = array<i32>} : memref<8x4xf32, #tpu.memory_space<vmem>>, vector<8x4xf32>,
    return
  }
  func.func @transform_0(%arg0: i32) -> (i32, i32) {
    %c0_i32 = arith.constant 0 : i32
    %c0_i32_0 = arith.constant 0 : i32
    return %arg0, %c0_i32 : i32, i32
  }
  func.func @transform_1(%arg0: i32) -> (i32, i32) {
    %c0_i32 = arith.constant 0 : i32
    %c0_i32_0 = arith.constant 0 : i32
    %c0_i32_1 = arith.constant 0 : i32
    return %c0_i32, %c0_i32_0 : i32, i32
  }
  func.func @transform_2(%arg0: i32) -> (i32, i32) {
    %c0_i32 = arith.constant 0 : i32
    %c0_i32_0 = arith.constant 0 : i32
    %c0_i32_1 = arith.constant 0 : i32
    return %c0_i32, %c0_i32_0 : i32, i32
  }
  func.func @transform_3(%arg0: i32) -> (i32, i32) {
    %c0_i32 = arith.constant 0 : i32
    %c0_i32_0 = arith.constant 0 : i32
    %c0_i32_1 = arith.constant 0 : i32
    return %c0_i32, %c0_i32_0 : i32, i32
  }
  func.func @transform_4(%arg0: i32) -> (i32, i32) {
    %c0_i32 = arith.constant 0 : i32
    %c0_i32_0 = arith.constant 0 : i32
    return %arg0, %c0_i32 : i32, i32
  }
}

</mosaic_0001>

<bundles_post_ra>
// kernel: pgn_forward.1
= control target key start
LH: loop header
LB: loop body
LE: loop exit
PB: predicated region body
PF: predicated region fallthrough
CT: control target
= control target key end

     0   :  { %9 = vsyncpa [#allocation3], 0  ;;  %s341_s18 = smov [#allocation2]   ;;  %s342_s20 = smov 64   ;;  %s390_s0 = inlined_call_operand.vmem [shape: bf16[8,8], index: 0, kind: input, shape index: {}]   ;;  %s391_s1 = inlined_call_operand.vmem [shape: bf16[8,128], index: 1, kind: input, shape index: {}]   ;;  %s392_s2 = inlined_call_operand.hbm [shape: bf16[256,128], index: 2, kind: input, shape index: {}]   ;;  %s393_s3 = inlined_call_operand.vmem [shape: f32[3,128], index: 3, kind: input, shape index: {}]   ;;  %s394_s4 = inlined_call_operand.vmem [shape: f32[8,4], index: 4, kind: output, shape index: {}]  }
   0x1   :  { %s18_s17 = sshll.u32 %s392_s2, 4  ;;  %s20_s19 = sshll.u32 %s341_s18, 4  ;;  %s19_s17 = int_to_ptr.hbm [resolvable:$true] %s18_s17  ;;  %s21_s19 = int_to_ptr.vmem [resolvable:$true] %s20_s19 }
   0x2   :  { %s343_s21 = smov 4  }
   0x3   :  { %26 = dma.hbm_to_vmem [thread:$0]  %s19_s17, 2048, %s21_s19, [#allocation3], %s342_s20, %s342_s20, %s343_s21  }
   0x4   :  { %339 = dma.done.wait [#allocation3], 2048  }
   0x5   :  { %340 = vsyncadd [#allocation3], 4294965248  ;;  %vm76_vm0 = vcmask 1043456   ;;  %v35_v0 = vld [vmem:[%s391_s1] sm:$0xf]  ;;  %v300_v1 = vld [vmem:[#allocation2 + $0x38] sm:$0xff] }
   0x6   :  { %v78_v2 = vsel %vm76_vm0, %v35_v0, 0  ;;  %v34_v3 = vld [vmem:[%s390_s0] sm:$0xf]  ;;  %vm72_vm1 = vcmask 64512   ;;  %144 = vmatpush.bf16.msra.mxu1 %v300_v1  ;;  %v299_v4 = vld [vmem:[#allocation2 + $0x30] sm:$0xff]  ;;  %v298_v5 = vld [vmem:[#allocation2 + $0x28] sm:$0xff] }
   0x7   :  { %87 = vmatpush.bf16.msra.mxu0 %v78_v2  ;;  %v297_v6 = vld [vmem:[#allocation2 + $0x20] sm:$0xff]  ;;  %v296_v7 = vld [vmem:[#allocation2 + $0x18] sm:$0xff]  ;;  %v295_v8 = vld [vmem:[#allocation2 + $0x10] sm:$0xff]  ;;  %vm221_vm2 = vcmask 31744  }
   0x8   :  { %v294_v9 = vld [vmem:[#allocation2 + $0x8] sm:$0xff]  ;;  %v293_v10 = vld [vmem:[#allocation2] sm:$0xff]  ;;  %v308_v11 = vld [vmem:[#allocation2 + $0x78] sm:$0xff] }
   0x9   :  { %208 = vmatpush.bf16.msra.mxu2 %v308_v11  ;;  %v307_v12 = vld [vmem:[#allocation2 + $0x70] sm:$0xff]  ;;  %v306_v13 = vld [vmem:[#allocation2 + $0x68] sm:$0xff]  ;;  %v305_v14 = vld [vmem:[#allocation2 + $0x60] sm:$0xff] }
   0xa   :  { %228 = vmatmul.msk.bf16.vlgmr.msra.gmra.mxu0 %vm72_vm1, %v34_v3  ;;  %145 = vmatpush.bf16.msra.mxu1 %v299_v4  ;;  %v304_v15 = vld [vmem:[#allocation2 + $0x58] sm:$0xff]  ;;  %v303_v16 = vld [vmem:[#allocation2 + $0x50] sm:$0xff]  ;;  %v312_v17 = vld [vmem:[%s393_s3] ss:$0 sm:$0xff] }
   0xb   :  { %v302_v23 = vld [vmem:[#allocation2 + $0x48] sm:$0xff]  ;;  %v301_v24 = vld [vmem:[#allocation2 + $0x40] sm:$0xff] }
   0xc   :  { %v313_v25 = vld [vmem:[%s393_s3 + $0x1] ss:$0 sm:$0xff]  ;;  %v314_v31 = vld [vmem:[%s393_s3 + $0x2] ss:$0 sm:$0xff] }
   0xd   :  { %209 = vmatpush.bf16.msra.mxu2 %v307_v12 }
   0xe   :  { %146 = vmatpush.bf16.msra.mxu1 %v298_v5 }
  0x11   :  { %210 = vmatpush.bf16.msra.mxu2 %v306_v13 }
  0x12   :  { %147 = vmatpush.bf16.msra.mxu1 %v297_v6 }
  0x15   :  { %211 = vmatpush.bf16.msra.mxu2 %v305_v14 }
  0x16   :  { %148 = vmatpush.bf16.msra.mxu1 %v296_v7 }
  0x19   :  { %212 = vmatpush.bf16.msra.mxu2 %v304_v15 }
  0x1a   :  { %149 = vmatpush.bf16.msra.mxu1 %v295_v8 }
  0x1d   :  { %213 = vmatpush.bf16.msra.mxu2 %v303_v16 }
  0x1e   :  { %150 = vmatpush.bf16.msra.mxu1 %v294_v9 }
  0x21   :  { %214 = vmatpush.bf16.msra.mxu2 %v302_v23 }
  0x22   :  { %151 = vmatpush.bf16.msra.mxu1 %v293_v10 }
  0x25   :  { %215 = vmatpush.bf16.msra.mxu2 %v301_v24 }
  0x87   :  { %v89_v18 = vpop.f32.mrf.mxu0 }
  0x88   :  { %v90_v19 = vadd.f32 %v312_v17, %v89_v18 }
  0x8a   :  { %v93_v20 = vmax.f32 %v90_v19, 0.0 }
  0x8c   :  { %v94_v21 = vpack.c.bf16 %v93_v20, %v93_v20 }
  0x8e   :  { %152 = vmatmul.bf16.vlgmr.msra.gmra.mxu1 %v94_v21 }
  0x8f   :  { %v91_v22 = vpop.f32.mrf.mxu0 }
 0x10b   :  { %v153_v26 = vpop.f32.mrf.mxu1 }
 0x10c   :  { %v154_v27 = vadd.f32 %v313_v25, %v153_v26 }
 0x10e   :  { %v157_v28 = vmax.f32 %v154_v27, 0.0 }
 0x110   :  { %v158_v29 = vpack.c.bf16 %v157_v28, %v157_v28 }
 0x112   :  { %216 = vmatmul.bf16.vlgmr.msra.gmra.mxu2 %v158_v29 }
 0x113   :  { %v155_v30 = vpop.f32.mrf.mxu1 }
 0x195   :  { %v217_v32 = vpop.f32.mrf.mxu2 }
 0x196   :  { %v218_v33 = vadd.f32 %v314_v31, %v217_v32 }
 0x198   :  { %222 = vst.msk [vmem:[%s394_s4] sm:$0xff] %vm221_vm2, %v218_v33 }
 0x19d   :  { %v219_v34 = vpop.f32.mrf.mxu2 }
 0x19e   :  { %227 = vsyncpa [#allocation3], 1 }

</bundles_post_ra>
